<compile_context>
chip_gen: v7x
topology: tpu7x:2x2x1
jax: 0.10.0
libtpu: 0.0.40
codegen_flags: <defaults>
</compile_context>

<pallas_src>
import functools

import jax
import jax.numpy as jnp
from jax import lax
from jax.experimental import pallas as pl
from jax.experimental.pallas import tpu as pltpu

LN_EPS = 1e-12


def _round_up(x, m):
    return ((x + m - 1) // m) * m


def _bert_self_output_kernel(x_ref, res_ref, w_ref, p_ref, o_ref, *,
                             h_real, h_pad, mxu_dtype):
    # x_ref:   (tm, Hp) tile of hidden_states             (activation dtype)
    # res_ref: (tm, Hp) tile of input_tensor (residual)   (activation dtype)
    # w_ref:   (Hp, Hp) dense weight, pre-transposed to (in, out) layout
    # p_ref:   (8, Hp)  fused params: row0=bias, row1=gamma, row2=beta (f32)
    # o_ref:   (tm, Hp) output tile
    x = x_ref[...]
    w = w_ref[...]
    if mxu_dtype is not None:
        x = x.astype(mxu_dtype)
        w = w.astype(mxu_dtype)

    # Dense: x @ W.T in PyTorch terms; W is already (in, out), so this is a
    # plain lane-vs-sublane contraction -> no per-step XLU transpose of the RHS.
    h = jnp.dot(x, w, preferred_element_type=jnp.float32)          # (tm, Hp) f32

    params = p_ref[...]
    bias = params[0:1, :]
    gamma = params[1:2, :]
    beta = params[2:3, :]

    # Dropout is identity in eval mode.
    # TODO(synk): training-mode dropout would use pltpu.prng_random_bits mask.

    y = h + bias + res_ref[...].astype(jnp.float32)

    # Two-pass LayerNorm over the REAL hidden width.  Padded lanes of y are
    # exactly zero (zero-padded x / weight / bias / residual), so the mean sum
    # is already correct; the centered values are re-masked before the variance
    # sum only when padding exists (compile-time condition).
    inv_h = jnp.float32(1.0 / h_real)
    mean = jnp.sum(y, axis=-1, keepdims=True) * inv_h
    centered = y - mean
    if h_pad:
        lane = lax.broadcasted_iota(jnp.int32, centered.shape, 1)
        centered = jnp.where(lane < h_real, centered, 0.0)
    var = jnp.sum(centered * centered, axis=-1, keepdims=True) * inv_h
    out = centered * lax.rsqrt(var + LN_EPS) * gamma + beta

    o_ref[...] = out.astype(o_ref.dtype)


def bert_self_output(hidden_states, input_tensor, weight, bias, gamma, beta,
                     *, tm=512, mxu_dtype=None):
    """y = LayerNorm(dropout(hidden_states @ W.T + b) + input_tensor), eps=1e-12.

    hidden_states, input_tensor: (B, S, H)
    weight: (H, H) in PyTorch nn.Linear (out, in) layout
    bias, gamma, beta: (H,)
    tm: target row tile (512 is a good default; 1024 pays off on v6e's 128 MiB VMEM)
    mxu_dtype: optional narrower matmul-operand dtype (e.g. jnp.bfloat16) for
      f32 models on v5e/v6e; f32 accumulation and epilogue are unchanged.
    """
    B, S, H = hidden_states.shape
    M = B * S
    dtype = hidden_states.dtype
    act_itemsize = jnp.dtype(dtype).itemsize
    sublane = 8 if act_itemsize >= 4 else (16 if act_itemsize == 2 else 32)

    # Lane-dense hidden axis.  No padding for lane-aligned H (BERT 768/1024);
    # otherwise pad to a multiple of 256 so 256x256 MXU passes stay full.
    Hp = H if H % 128 == 0 else _round_up(H, 256)
    h_pad = Hp != H

    x2d = hidden_states.reshape(M, H)
    r2d = input_tensor.reshape(M, H)
    w_t = weight.T                       # one-time (out,in)->(in,out); free for static weights
    if h_pad:
        x2d = jnp.pad(x2d, ((0, 0), (0, Hp - H)))
        r2d = jnp.pad(r2d, ((0, 0), (0, Hp - H)))
        w_t = jnp.pad(w_t, ((0, Hp - H), (0, Hp - H)))
    if mxu_dtype is not None:
        w_t = w_t.astype(mxu_dtype)      # one-time cast of the static weight
    w_itemsize = jnp.dtype(w_t.dtype).itemsize

    # --- VMEM budget & row-tile selection -----------------------------------
    try:
        phys_vmem = int(pltpu.get_tpu_info().vmem_capacity_bytes)
    except Exception:
        phys_vmem = 64 << 20             # conservative (v7x per-core VMEM)
    vmem_cap = (phys_vmem * 7) // 8      # leave headroom for compiler scratch

    w_bytes = Hp * Hp * w_itemsize
    params_bytes = 8 * Hp * 4

    def _budget(t):
        in_tiles = 2 * 2 * t * Hp * act_itemsize   # x + residual, double-buffered
        out_tiles = 2 * t * Hp * act_itemsize      # output, double-buffered
        f32_tmp = 3 * t * Hp * 4                   # h / y / centered intermediates
        return 2 * w_bytes + 2 * params_bytes + in_tiles + out_tiles + f32_tmp

    slack = 4 << 20
    # Large tile to amortize per-step overhead, capped at ceil(M/2) so the grid
    # has >= 2 steps (keeps both v7x TensorCores busy), shrunk until it fits.
    tm_eff = max(min(_round_up(tm, sublane),
                     _round_up(pl.cdiv(M, 2), sublane)), sublane)
    while tm_eff > sublane and _budget(tm_eff) + slack > vmem_cap:
        tm_eff = max(_round_up(tm_eff // 2, sublane), sublane)
    # TODO(synk): for very large H (resident weight alone near the cap, e.g.
    # f32 H >= ~2048 on v7x) tile the output axis with a second grid dimension
    # + accumulating VMEM scratch and run the LayerNorm in a pl.when(last-step)
    # epilogue instead of keeping the full (Hp, Hp) weight resident.

    vmem_limit = int(min(max(_budget(tm_eff) + slack, 32 << 20), vmem_cap))
    grid = (pl.cdiv(M, tm_eff),)

    # Fuse bias / gamma / beta into one lane-dense (8, Hp) f32 slab.
    params = jnp.zeros((8, Hp), jnp.float32)
    params = params.at[0, :H].set(bias.astype(jnp.float32))
    params = params.at[1, :H].set(gamma.astype(jnp.float32))
    params = params.at[2, :H].set(beta.astype(jnp.float32))

    kernel = functools.partial(_bert_self_output_kernel,
                               h_real=H, h_pad=h_pad, mxu_dtype=mxu_dtype)

    def _call(single_buffer_consts):
        const_kw = ({"pipeline_mode": pl.Buffered(1)}
                    if single_buffer_consts else {})
        return pl.pallas_call(
            kernel,
            out_shape=jax.ShapeDtypeStruct((M, Hp), dtype),
            grid_spec=pltpu.PrefetchScalarGridSpec(
                num_scalar_prefetch=0,
                grid=grid,
                in_specs=[
                    pl.BlockSpec((tm_eff, Hp), lambda i: (i, 0)),          # hidden_states tile
                    pl.BlockSpec((tm_eff, Hp), lambda i: (i, 0)),          # residual tile
                    pl.BlockSpec((Hp, Hp), lambda i: (0, 0), **const_kw),  # weight (resident)
                    pl.BlockSpec((8, Hp), lambda i: (0, 0), **const_kw),   # bias/gamma/beta
                ],
                out_specs=pl.BlockSpec((tm_eff, Hp), lambda i: (i, 0)),
            ),
            compiler_params=pltpu.CompilerParams(
                dimension_semantics=("parallel",),
                vmem_limit_bytes=vmem_limit,
            ),
        )(x2d, r2d, w_t, params)

    try:
        out2d = _call(True)    # single-buffer the constant weight / params
    except Exception:
        # Compatibility fallback for jax versions without BlockSpec
        # pipeline_mode=pl.Buffered support: default double-buffering.
        out2d = _call(False)

    if h_pad:
        out2d = out2d[:, :H]
    return out2d.reshape(B, S, H)


def _reference(hidden_states, input_tensor, weight, bias, gamma, beta):
    h = jnp.einsum("bsh,oh->bso", hidden_states, weight) + bias
    y = h + input_tensor
    mean = jnp.mean(y, axis=-1, keepdims=True)
    var = jnp.mean((y - mean) ** 2, axis=-1, keepdims=True)
    return (y - mean) / jnp.sqrt(var + LN_EPS) * gamma + beta


if __name__ == "__main__":
    B, S, H = 2, 8, 32  # batch, seq, hidden_size

    key = jax.random.PRNGKey(0)
    k1, k2, k3, k4 = jax.random.split(key, 4)

    hidden_states = jax.random.normal(k1, (B, S, H), dtype=jnp.float32)
    input_tensor = jax.random.normal(k2, (B, S, H), dtype=jnp.float32)

    # Linear params in PyTorch layout (out, in) + bias; LayerNorm gamma=1, beta=0.
    weight = jax.random.normal(k3, (H, H), dtype=jnp.float32) * (1.0 / jnp.sqrt(H))
    bias = jax.random.normal(k4, (H,), dtype=jnp.float32) * 0.02
    gamma = jnp.ones((H,), dtype=jnp.float32)
    beta = jnp.zeros((H,), dtype=jnp.float32)

    out = bert_self_output(hidden_states, input_tensor, weight, bias, gamma, beta)
    out = jax.block_until_ready(out)

    ref = _reference(hidden_states, input_tensor, weight, bias, gamma, beta)
    assert out.shape == (B, S, H)
    assert jnp.allclose(out, ref, atol=1e-4, rtol=1e-4), "mismatch vs reference"

    print("KERNEL_OK")
</pallas_src>

<mosaic_0001>
module attributes {stable_mosaic.version = 11 : i64} {
  func.func @_bert_self_output_kernel(%arg0: i32, %arg1: memref<8x256xf32, #tpu.memory_space<vmem>>, %arg2: memref<8x256xf32, #tpu.memory_space<vmem>>, %arg3: memref<256x256xf32, #tpu.memory_space<vmem>>, %arg4: memref<8x256xf32, #tpu.memory_space<vmem>>, %arg5: memref<8x256xf32, #tpu.memory_space<vmem>>) attributes {dimension_semantics = [#tpu.dimension_semantics<parallel>], iteration_bounds = array<i64: 2>, scalar_prefetch = 0 : i64, scratch_operands = 0 : i64, tpu.core_type = #tpu.core_type<tc>, window_params = [{transform_indices = @transform_0, window_bounds = array<i64: 8, 256>}, {transform_indices = @transform_1, window_bounds = array<i64: 8, 256>}, {pipeline_mode = #tpu.pipeline_mode<synchronous>, transform_indices = @transform_2, window_bounds = array<i64: 256, 256>}, {pipeline_mode = #tpu.pipeline_mode<synchronous>, transform_indices = @transform_3, window_bounds = array<i64: 8, 256>}, {transform_indices = @transform_4, window_bounds = array<i64: 8, 256>}]} {
    %c0 = arith.constant 0 : index
    %c0_0 = arith.constant 0 : index
    %0 = vector.load %arg1[%c0, %c0_0] : memref<8x256xf32, #tpu.memory_space<vmem>>, vector<8x256xf32>
    %c0_1 = arith.constant 0 : index
    %c0_2 = arith.constant 0 : index
    %1 = vector.load %arg3[%c0_1, %c0_2] : memref<256x256xf32, #tpu.memory_space<vmem>>, vector<256x256xf32>
    %cst = arith.constant dense<0.000000e+00> : vector<8x256xf32>
    %2 = tpu.matmul %0, %1, %cst {dimension_numbers = #tpu.dot_dimension_numbers<[1], [0], [0], [1], [0, 0, 1, 1], [], []>} : vector<8x256xf32>, vector<256x256xf32>, vector<8x256xf32> -> vector<8x256xf32>
    %c0_3 = arith.constant 0 : index
    %c0_4 = arith.constant 0 : index
    %3 = vector.load %arg4[%c0_3, %c0_4] : memref<8x256xf32, #tpu.memory_space<vmem>>, vector<8x256xf32>
    %4 = vector.extract_strided_slice %3 {offsets = [0, 0], sizes = [1, 256], strides = [1, 1]} : vector<8x256xf32> to vector<1x256xf32>
    %5 = vector.extract_strided_slice %3 {offsets = [1, 0], sizes = [1, 256], strides = [1, 1]} : vector<8x256xf32> to vector<1x256xf32>
    %6 = vector.extract_strided_slice %3 {offsets = [2, 0], sizes = [1, 256], strides = [1, 1]} : vector<8x256xf32> to vector<1x256xf32>
    %7 = vector.broadcast %4 : vector<1x256xf32> to vector<8x256xf32>
    %8 = arith.addf %2, %7 : vector<8x256xf32>
    %c0_5 = arith.constant 0 : index
    %c0_6 = arith.constant 0 : index
    %9 = vector.load %arg2[%c0_5, %c0_6] : memref<8x256xf32, #tpu.memory_space<vmem>>, vector<8x256xf32>
    %10 = arith.addf %8, %9 : vector<8x256xf32>
    %cst_7 = arith.constant dense<0.000000e+00> : vector<8xf32>
    %11 = vector.multi_reduction <add>, %10, %cst_7 [1] : vector<8x256xf32> to vector<8xf32>
    %12 = vector.shape_cast %11 : vector<8xf32> to vector<8x1xf32>
    %cst_8 = arith.constant 3.125000e-02 : f32
    %13 = vector.broadcast %cst_8 : f32 to vector<8x1xf32>
    %14 = arith.mulf %12, %13 : vector<8x1xf32>
    %15 = vector.broadcast %14 : vector<8x1xf32> to vector<8x256xf32>
    %16 = arith.subf %10, %15 : vector<8x256xf32>
    %17 = tpu.iota {dimensions = array<i32: 1>} : vector<8x256xi32>
    %c32_i32 = arith.constant 32 : i32
    %18 = vector.broadcast %c32_i32 : i32 to vector<8x256xi32>
    %19 = arith.cmpi slt, %17, %18 : vector<8x256xi32>
    %cst_9 = arith.constant 0.000000e+00 : f32
    %20 = vector.broadcast %cst_9 : f32 to vector<8x256xf32>
    %21 = arith.select %19, %16, %20 : vector<8x256xi1>, vector<8x256xf32>
    %22 = arith.mulf %21, %21 : vector<8x256xf32>
    %cst_10 = arith.constant dense<0.000000e+00> : vector<8xf32>
    %23 = vector.multi_reduction <add>, %22, %cst_10 [1] : vector<8x256xf32> to vector<8xf32>
    %24 = vector.shape_cast %23 : vector<8xf32> to vector<8x1xf32>
    %cst_11 = arith.constant 3.125000e-02 : f32
    %25 = vector.broadcast %cst_11 : f32 to vector<8x1xf32>
    %26 = arith.mulf %24, %25 : vector<8x1xf32>
    %cst_12 = arith.constant 9.99999996E-13 : f32
    %27 = vector.broadcast %cst_12 : f32 to vector<8x1xf32>
    %28 = arith.addf %26, %27 : vector<8x1xf32>
    %29 = math.rsqrt %28 : vector<8x1xf32>
    %30 = vector.broadcast %29 : vector<8x1xf32> to vector<8x256xf32>
    %31 = arith.mulf %21, %30 : vector<8x256xf32>
    %32 = vector.broadcast %5 : vector<1x256xf32> to vector<8x256xf32>
    %33 = arith.mulf %31, %32 : vector<8x256xf32>
    %34 = vector.broadcast %6 : vector<1x256xf32> to vector<8x256xf32>
    %35 = arith.addf %33, %34 : vector<8x256xf32>
    %c0_13 = arith.constant 0 : index
    %c0_14 = arith.constant 0 : index
    %36 = vector.load %arg5[%c0_13, %c0_14] : memref<8x256xf32, #tpu.memory_space<vmem>>, vector<8x256xf32>
    tpu.vector_store %arg5[%c0_13, %c0_14], %35 {strides = array<i32>} : memref<8x256xf32, #tpu.memory_space<vmem>>, vector<8x256xf32>,
    return
  }
  func.func @transform_0(%arg0: i32) -> (i32, i32) {
    %c0_i32 = arith.constant 0 : i32
    %c0_i32_0 = arith.constant 0 : i32
    return %arg0, %c0_i32 : i32, i32
  }
  func.func @transform_1(%arg0: i32) -> (i32, i32) {
    %c0_i32 = arith.constant 0 : i32
    %c0_i32_0 = arith.constant 0 : i32
    return %arg0, %c0_i32 : i32, i32
  }
  func.func @transform_2(%arg0: i32) -> (i32, i32) {
    %c0_i32 = arith.constant 0 : i32
    %c0_i32_0 = arith.constant 0 : i32
    %c0_i32_1 = arith.constant 0 : i32
    return %c0_i32, %c0_i32_0 : i32, i32
  }
  func.func @transform_3(%arg0: i32) -> (i32, i32) {
    %c0_i32 = arith.constant 0 : i32
    %c0_i32_0 = arith.constant 0 : i32
    %c0_i32_1 = arith.constant 0 : i32
    return %c0_i32, %c0_i32_0 : i32, i32
  }
  func.func @transform_4(%arg0: i32) -> (i32, i32) {
    %c0_i32 = arith.constant 0 : i32
    %c0_i32_0 = arith.constant 0 : i32
    return %arg0, %c0_i32 : i32, i32
  }
}

module attributes {stable_mosaic.version = 11 : i64} {
  func.func @_bert_self_output_kernel(%arg0: i32, %arg1: memref<8x256xf32, #tpu.memory_space<vmem>>, %arg2: memref<8x256xf32, #tpu.memory_space<vmem>>, %arg3: memref<256x256xf32, #tpu.memory_space<vmem>>, %arg4: memref<8x256xf32, #tpu.memory_space<vmem>>, %arg5: memref<8x256xf32, #tpu.memory_space<vmem>>) attributes {dimension_semantics = [#tpu.dimension_semantics<parallel>], iteration_bounds = array<i64: 2>, scalar_prefetch = 0 : i64, scratch_operands = 0 : i64, tpu.core_type = #tpu.core_type<tc>, window_params = [{transform_indices = @transform_0, window_bounds = array<i64: 8, 256>}, {transform_indices = @transform_1, window_bounds = array<i64: 8, 256>}, {pipeline_mode = #tpu.pipeline_mode<synchronous>, transform_indices = @transform_2, window_bounds = array<i64: 256, 256>}, {pipeline_mode = #tpu.pipeline_mode<synchronous>, transform_indices = @transform_3, window_bounds = array<i64: 8, 256>}, {transform_indices = @transform_4, window_bounds = array<i64: 8, 256>}]} {
    %c0 = arith.constant 0 : index
    %c0_0 = arith.constant 0 : index
    %0 = vector.load %arg1[%c0, %c0_0] : memref<8x256xf32, #tpu.memory_space<vmem>>, vector<8x256xf32>
    %c0_1 = arith.constant 0 : index
    %c0_2 = arith.constant 0 : index
    %1 = vector.load %arg3[%c0_1, %c0_2] : memref<256x256xf32, #tpu.memory_space<vmem>>, vector<256x256xf32>
    %cst = arith.constant dense<0.000000e+00> : vector<8x256xf32>
    %2 = tpu.matmul %0, %1, %cst {dimension_numbers = #tpu.dot_dimension_numbers<[1], [0], [0], [1], [0, 0, 1, 1], [], []>} : vector<8x256xf32>, vector<256x256xf32>, vector<8x256xf32> -> vector<8x256xf32>
    %c0_3 = arith.constant 0 : index
    %c0_4 = arith.constant 0 : index
    %3 = vector.load %arg4[%c0_3, %c0_4] : memref<8x256xf32, #tpu.memory_space<vmem>>, vector<8x256xf32>
    %4 = vector.extract_strided_slice %3 {offsets = [0, 0], sizes = [1, 256], strides = [1, 1]} : vector<8x256xf32> to vector<1x256xf32>
    %5 = vector.extract_strided_slice %3 {offsets = [1, 0], sizes = [1, 256], strides = [1, 1]} : vector<8x256xf32> to vector<1x256xf32>
    %6 = vector.extract_strided_slice %3 {offsets = [2, 0], sizes = [1, 256], strides = [1, 1]} : vector<8x256xf32> to vector<1x256xf32>
    %7 = vector.broadcast %4 : vector<1x256xf32> to vector<8x256xf32>
    %8 = arith.addf %2, %7 : vector<8x256xf32>
    %c0_5 = arith.constant 0 : index
    %c0_6 = arith.constant 0 : index
    %9 = vector.load %arg2[%c0_5, %c0_6] : memref<8x256xf32, #tpu.memory_space<vmem>>, vector<8x256xf32>
    %10 = arith.addf %8, %9 : vector<8x256xf32>
    %cst_7 = arith.constant dense<0.000000e+00> : vector<8xf32>
    %11 = vector.multi_reduction <add>, %10, %cst_7 [1] : vector<8x256xf32> to vector<8xf32>
    %12 = vector.shape_cast %11 : vector<8xf32> to vector<8x1xf32>
    %cst_8 = arith.constant 3.125000e-02 : f32
    %13 = vector.broadcast %cst_8 : f32 to vector<8x1xf32>
    %14 = arith.mulf %12, %13 : vector<8x1xf32>
    %15 = vector.broadcast %14 : vector<8x1xf32> to vector<8x256xf32>
    %16 = arith.subf %10, %15 : vector<8x256xf32>
    %17 = tpu.iota {dimensions = array<i32: 1>} : vector<8x256xi32>
    %c32_i32 = arith.constant 32 : i32
    %18 = vector.broadcast %c32_i32 : i32 to vector<8x256xi32>
    %19 = arith.cmpi slt, %17, %18 : vector<8x256xi32>
    %cst_9 = arith.constant 0.000000e+00 : f32
    %20 = vector.broadcast %cst_9 : f32 to vector<8x256xf32>
    %21 = arith.select %19, %16, %20 : vector<8x256xi1>, vector<8x256xf32>
    %22 = arith.mulf %21, %21 : vector<8x256xf32>
    %cst_10 = arith.constant dense<0.000000e+00> : vector<8xf32>
    %23 = vector.multi_reduction <add>, %22, %cst_10 [1] : vector<8x256xf32> to vector<8xf32>
    %24 = vector.shape_cast %23 : vector<8xf32> to vector<8x1xf32>
    %cst_11 = arith.constant 3.125000e-02 : f32
    %25 = vector.broadcast %cst_11 : f32 to vector<8x1xf32>
    %26 = arith.mulf %24, %25 : vector<8x1xf32>
    %cst_12 = arith.constant 9.99999996E-13 : f32
    %27 = vector.broadcast %cst_12 : f32 to vector<8x1xf32>
    %28 = arith.addf %26, %27 : vector<8x1xf32>
    %29 = math.rsqrt %28 : vector<8x1xf32>
    %30 = vector.broadcast %29 : vector<8x1xf32> to vector<8x256xf32>
    %31 = arith.mulf %21, %30 : vector<8x256xf32>
    %32 = vector.broadcast %5 : vector<1x256xf32> to vector<8x256xf32>
    %33 = arith.mulf %31, %32 : vector<8x256xf32>
    %34 = vector.broadcast %6 : vector<1x256xf32> to vector<8x256xf32>
    %35 = arith.addf %33, %34 : vector<8x256xf32>
    %c0_13 = arith.constant 0 : index
    %c0_14 = arith.constant 0 : index
    %36 = vector.load %arg5[%c0_13, %c0_14] : memref<8x256xf32, #tpu.memory_space<vmem>>, vector<8x256xf32>
    tpu.vector_store %arg5[%c0_13, %c0_14], %35 {strides = array<i32>} : memref<8x256xf32, #tpu.memory_space<vmem>>, vector<8x256xf32>,
    return
  }
  func.func @transform_0(%arg0: i32) -> (i32, i32) {
    %c0_i32 = arith.constant 0 : i32
    %c0_i32_0 = arith.constant 0 : i32
    return %arg0, %c0_i32 : i32, i32
  }
  func.func @transform_1(%arg0: i32) -> (i32, i32) {
    %c0_i32 = arith.constant 0 : i32
    %c0_i32_0 = arith.constant 0 : i32
    return %arg0, %c0_i32 : i32, i32
  }
  func.func @transform_2(%arg0: i32) -> (i32, i32) {
    %c0_i32 = arith.constant 0 : i32
    %c0_i32_0 = arith.constant 0 : i32
    %c0_i32_1 = arith.constant 0 : i32
    return %c0_i32, %c0_i32_0 : i32, i32
  }
  func.func @transform_3(%arg0: i32) -> (i32, i32) {
    %c0_i32 = arith.constant 0 : i32
    %c0_i32_0 = arith.constant 0 : i32
    %c0_i32_1 = arith.constant 0 : i32
    return %c0_i32, %c0_i32_0 : i32, i32
  }
  func.func @transform_4(%arg0: i32) -> (i32, i32) {
    %c0_i32 = arith.constant 0 : i32
    %c0_i32_0 = arith.constant 0 : i32
    return %arg0, %c0_i32 : i32, i32
  }
}

</mosaic_0001>

<bundles_post_ra>
// kernel: tpu_custom_call.1
= control target key start
LH: loop header
LB: loop body
LE: loop exit
PB: predicated region body
PF: predicated region fallthrough
CT: control target
= control target key end

     0   :  { %s1277_s0 = inlined_call_operand.hbm [shape: f32[16,256], index: 0, kind: input, shape index: {}]   ;;  %s1278_s1 = inlined_call_operand.hbm [shape: f32[16,256], index: 1, kind: input, shape index: {}]   ;;  %s1279_s2 = inlined_call_operand.hbm [shape: f32[256,256], index: 2, kind: input, shape index: {}]   ;;  %s1280_s3 = inlined_call_operand.hbm [shape: f32[8,256], index: 3, kind: input, shape index: {}]   ;;  %s1281_s4 = inlined_call_operand.hbm [shape: f32[16,256], index: 4, kind: output, shape index: {}]  }
   0x1   :  { %1286 = sst [smem:[#allocation16_spill]] %s1279_s2 }
   0x2   :  { %9 = vsyncpa [#allocation3], 0 }
   0x3   :  { %11 = vsyncpa [#allocation3 + $0x1], 0 }
   0x4   :  { %12 = vsyncpa [#allocation6], 0 }
   0x5   :  { %14 = vsyncpa [#allocation6 + $0x1], 0 }
   0x6   :  { %15 = vsyncpa [#allocation9], 0 }
   0x7   :  { %16 = vsyncpa [#allocation4], 0 }
   0x8   :  { %18 = vsyncpa [#allocation4 + $0x1], 0  ;;  %s995_s15 = smov 0   ;;  %s997_s16 = smov 0  }
   0x9   :  { %s999_s17 = smov 0   ;;  %s1001_s18 = smov 0  }
   0xa LB: > { %s1016_s19 = sadd.s32 4294967295, %s961_s18   ;;  %s602_s20 = sadd.s32 4294967294, %s961_s18   ;;  %s961_s18 = sphi %s1001_s18, %s1307_s18   ;;  %s957_s17 = sphi %s999_s17, %s1306_s17   ;;  %s953_s16 = sphi %s997_s16, %s1305_s16   ;;  %s949_s15 = sphi %s995_s15, %s1304_s15  }
   0xb   : > { %p44_p0 = scmp.ne.s32.totalorder %s953_s16, %s949_s15  ;;  %p1282_p1 = scmp.eq.s32.totalorder %s1016_s19, 0 }
   0xc   : > { %p142_p3 = scmp.eq.s32.totalorder %s602_s20, 1  ;;  %p603_p5 = scmp.ge.s32.totalorder %s961_s18, 1 }
   0xd   : > { %p1025_p4 = por %p1282_p1, %p44_p0  ;;  %p149_p7 = scmp.lt.s32.totalorder %s961_s18, 3 }
   0xe   : > { %p1030_p6 = por %p142_p3, %p44_p0  ;;  %s963_s24 = smov [#allocation7]  }
   0xf   : > { %s1287_s21 = scalar_select %p1025_p4, 1, 0 }
  0x10   : > { %s1288_s22 = scalar_select %p1030_p6, 1, 0 }
  0x11   : > { %p1035_p8 = pnand %p603_p5, %p149_p7  ;;  %s161_s25 = sshll.u32 %s963_s24, 4  ;;  %s1039_s25 = int_to_ptr.vmem [resolvable:$true] %s161_s25 }
  0x12   : > { %s964_s27 = smov [#allocation8]   ;;  %s1291_s2 = sld [smem:[#allocation16_spill]] }
  0x13   : > { %s1289_s23 = scalar_select %p1035_p8, 1, 0 }
  0x14   : > { %p705_p9 = pneg %p1035_p8  ;;  %s175_s28 = sshll.u32 %s964_s27, 4  ;;  %s1050_s28 = int_to_ptr.vmem [resolvable:$true] %s175_s28 }
  0x16   : > { %p1046_p11 = pnand %p705_p9, %p1282_p1 }
  0x18   : > { %s767_s5 = scalar_lea.hbm %s1291_s2, 8192  ;;  %p769_p13 = pneg %p1046_p11 }
  0x19   : > { %p768_p12 = scmp.ne.s32.totalorder %s1291_s2, %s767_s5  ;;  %p774_p5 = scmp.lt.u32.totalorder %s767_s5, %s1291_s2 }
  0x1b   : > { %p770_p0 = pnand %p769_p13, %p768_p12 }
  0x1d   : > { %p771_p3 = pneg %p770_p0 }
  0x1f   : > { %p776_p7 = pnand %p774_p5, %p771_p3 }
  0x21   : > { %779 = shalt.err (!%p776_p7)
}
  0x22   : > { %s780_s10 = scalar_lea.vmem %s1039_s25, 8192  ;;  %p788_p2 = scmp.lt.s32.totalorder %s1039_s25, %s1039_s25 }
  0x23   : > { %p781_p9 = scmp.ne.s32.totalorder %s1039_s25, %s780_s10  ;;  %p789_p12 = scmp.lt.s32.totalorder %s780_s10, %s780_s10 }
  0x25   : > { %p783_p10 = pnand %p781_p9, %p769_p13  ;;  %p790_p0 = por %p789_p12, %p788_p2 }
  0x27   : > { %p784_p1 = pneg %p783_p10 }
  0x29   : > { %p791_p6 = pnand %p790_p0, %p784_p1 }
  0x2b   : > { %794 = shalt.err (!%p791_p6)
}
  0x2c   : > { %s965_s11 = smov 256   ;;  %s966_s12 = smov 16  }
  0x2d   : > { %708 = dma.hbm_to_vmem [thread:$0]  (!%p1046_p11), %s1291_s2, 8192, %s1039_s25, [#allocation6], %s965_s11, %s965_s11, %s966_s12  }
  0x2e   : > { %s795_s27 = scalar_lea.hbm %s1280_s3, 256 }
  0x2f   : > { %p796_p2 = scmp.ne.s32.totalorder %s1280_s3, %s795_s27  ;;  %p802_p10 = scmp.lt.u32.totalorder %s795_s27, %s1280_s3 }
  0x31   : > { %p798_p1 = pnand %p796_p2, %p769_p13 }
  0x33   : > { %p799_p6 = pneg %p798_p1 }
  0x35   : > { %p804_p3 = pnand %p802_p10, %p799_p6 }
  0x37   : > { %807 = shalt.err (!%p804_p3)
}
  0x38   : > { %s808_s25 = scalar_lea.vmem %s1050_s28, 256  ;;  %p816_p12 = scmp.lt.s32.totalorder %s1050_s28, %s1050_s28 }
  0x39   : > { %p809_p5 = scmp.ne.s32.totalorder %s1050_s28, %s808_s25  ;;  %p817_p0 = scmp.lt.s32.totalorder %s808_s25, %s808_s25 }
  0x3b   : > { %p811_p7 = pnand %p809_p5, %p769_p13  ;;  %p818_p2 = por %p817_p0, %p816_p12 }
  0x3d   : > { %p812_p9 = pneg %p811_p7 }
  0x3f   : > { %p819_p1 = pnand %p818_p2, %p812_p9 }
  0x41   : > { %822 = shalt.err (!%p819_p1)
}
  0x42   : > { %711 = dma.hbm_to_vmem [thread:$0]  (!%p1046_p11), %s1280_s3, 256, %s1050_s28, [#allocation9]  }
  0x43   : > { %s1105_s9 = sadd.s32 1, %s961_s18   ;;  %s31_s26 = sadd.s32 1, %s957_s17 }
  0x44   : > { %s28_s10 = ssub.s32 %s961_s18, %s1105_s9  ;;  %p38_p13 = scmp.ne.s32.totalorder %s957_s17, %s953_s16 }
  0x45   : > { %p29_p6 = scmp.eq.s32.totalorder %s28_s10, 0  ;;  %p39_p10 = scmp.eq.s32.totalorder %s961_s18, 0 }
  0x46   : > { %p1292_p3 = scmp.eq.s32.totalorder %s1016_s19, 1  ;;  %p725_p7 = scmp.lt.s32.totalorder %s961_s18, 2 }
  0x47   : > { %s1121_s12 = scalar_select %p29_p6, %s957_s17, %s31_s26  }
  0x48   : > { %p1115_p5 = por %p1292_p3, %p38_p13  ;;  %p40_p9 = por %p39_p10, %p38_p13 }
  0x49   : > { %s186_s13 = sand.u32 1, %s957_s17   ;;  %s624_s14 = sshll.u32 %s961_s18, 8 }
  0x4a   : > { %s1293_s11 = scalar_select %p1115_p5, 1, 0 }
  0x4b   : > { %s1124_s28 = sshll.u32 %s186_s13, 4  ;;  %s1130_s27 = scalar_lea.hbm %s1277_s0, %s624_s14 }
  0x4c   : > { %s190_s29 = scalar_lea.vmem [#allocation2], %s1124_s28  ;;  %p1135_p11 = pnand %p725_p7, %p40_p9 }
  0x4d   : > { %s198_s30 = sshll.u32 %s190_s29, 4  ;;  %s1142_s7 = scalar_lea.hbm %s1278_s1, %s624_s14  ;;  %s1133_s30 = int_to_ptr.vmem [resolvable:$true] %s198_s30 }
  0x4e   : > { %s205_s8 = sand.u32 1, %s961_s18   ;;  %s187_s26 = scalar_lea.sflag [#allocation3], %s186_s13 }
  0x4f   : > { %s823_s10 = scalar_lea.hbm %s1130_s27, 256  ;;  %p825_p0 = pneg %p1135_p11 }
  0x50   : > { %p824_p12 = scmp.ne.s32.totalorder %s1130_s27, %s823_s10  ;;  %s828_s29 = scalar_lea.hbm %s1277_s0, 512 }
  0x51   : > { %p829_p13 = scmp.lt.u32.totalorder %s1130_s27, %s1277_s0  ;;  %p830_p6 = scmp.lt.u32.totalorder %s828_s29, %s823_s10 }
  0x52   : > { %p826_p2 = pnand %p825_p0, %p824_p12  ;;  %p832_p3 = scmp.lt.u32.totalorder %s823_s10, %s1130_s27 }
  0x53   : > { %p831_p10 = por %p830_p6, %p829_p13 }
  0x54   : > { %p827_p1 = pneg %p826_p2 }
  0x55   : > { %p833_p7 = por %p832_p3, %p831_p10 }
  0x57   : > { %p834_p9 = pnand %p833_p7, %p827_p1 }
  0x59   : > { %837 = shalt.err (!%p834_p9)
}
  0x5a   : > { %s838_s13 = scalar_lea.vmem %s1133_s30, 256  ;;  %s967_s14 = smov [#allocation2]  }
  0x5b   : > { %p839_p12 = scmp.ne.s32.totalorder %s1133_s30, %s838_s13  ;;  %s843_s25 = sshll.u32 %s967_s14, 4  ;;  %s844_s25 = int_to_ptr.vmem [resolvable:$false] %s843_s25 }
  0x5c   : > { %s845_s2 = scalar_lea.vmem %s844_s25, 512  ;;  %p846_p4 = scmp.lt.s32.totalorder %s1133_s30, %s844_s25 }
  0x5d   : > { %p841_p2 = pnand %p839_p12, %p825_p0  ;;  %p847_p13 = scmp.lt.s32.totalorder %s845_s2, %s838_s13 }
  0x5f   : > { %p842_p5 = pneg %p841_p2  ;;  %p848_p6 = por %p847_p13, %p846_p4 }
  0x61   : > { %p849_p10 = pnand %p848_p6, %p842_p5 }
  0x63   : > { %852 = shalt.err (!%p849_p10)
}
  0x64   : > { %715 = dma.hbm_to_vmem [thread:$0]  (!%p1135_p11), %s1130_s27, 256, %s1133_s30, %s187_s26  }
  0x65   : > { %s209_s10 = scalar_lea.vmem [#allocation5], %s1124_s28  ;;  %s206_s24 = scalar_lea.sflag [#allocation6], %s205_s8 }
  0x66   : > { %s217_s20 = sshll.u32 %s209_s10, 4  ;;  %s853_s29 = scalar_lea.hbm %s1142_s7, 256  ;;  %s218_s20 = int_to_ptr.vmem [resolvable:$true] %s217_s20 }
  0x67   : > { %p854_p4 = scmp.ne.s32.totalorder %s1142_s7, %s853_s29  ;;  %s858_s14 = scalar_lea.hbm %s1278_s1, 512 }
  0x68   : > { %p859_p3 = scmp.lt.u32.totalorder %s1142_s7, %s1278_s1  ;;  %p860_p7 = scmp.lt.u32.totalorder %s858_s14, %s853_s29 }
  0x69   : > { %p856_p5 = pnand %p854_p4, %p825_p0  ;;  %p862_p12 = scmp.lt.u32.totalorder %s853_s29, %s1142_s7 }
  0x6a   : > { %p861_p9 = por %p860_p7, %p859_p3 }
  0x6b   : > { %p857_p1 = pneg %p856_p5 }
  0x6c   : > { %p863_p2 = por %p862_p12, %p861_p9 }
  0x6e   : > { %p864_p13 = pnand %p863_p2, %p857_p1 }
  0x70   : > { %867 = shalt.err (!%p864_p13)
}
  0x71   : > { %s868_s28 = scalar_lea.vmem %s218_s20, 256  ;;  %s968_s27 = smov [#allocation5]  }
  0x72   : > { %p869_p6 = scmp.ne.s32.totalorder %s218_s20, %s868_s28  ;;  %s873_s30 = sshll.u32 %s968_s27, 4  ;;  %s874_s30 = int_to_ptr.vmem [resolvable:$false] %s873_s30 }
  0x73   : > { %s875_s8 = scalar_lea.vmem %s874_s30, 512  ;;  %p876_p5 = scmp.lt.s32.totalorder %s218_s20, %s874_s30 }
  0x74   : > { %p871_p10 = pnand %p869_p6, %p825_p0  ;;  %p877_p8 = scmp.lt.s32.totalorder %s875_s8, %s868_s28 }
  0x76   : > { %p872_p4 = pneg %p871_p10  ;;  %p878_p3 = por %p877_p8, %p876_p5 }
  0x78   : > { %p879_p7 = pnand %p878_p3, %p872_p4 }
  0x7a   : > { %882 = shalt.err (!%p879_p7)
}
  0x7b   : > { %718 = dma.hbm_to_vmem [thread:$0]  (!%p1135_p11), %s1142_s7, 256, %s218_s20, %s206_s24  }
  0x7c   : > { %p1295_p1 = scmp.ne.s32.totalorder %s1289_s23, 0 }
  0x7d   : > { %s1195_s26 = sand.u32 (!%p1295_p1), 1, %s953_s16   ;;  %p1296_p8 = scmp.ne.s32.totalorder (!%p1295_p1), %s1287_s21, 0 }
  0x7e   : > { %226 = sbr.rel (%p1295_p1) target bundleno = 756 (0x2f4), region = 36  ;;  %s1198_s10 = sshll.u32 (!%p1295_p1), %s1195_s26, 4 }
  0x7f   : > { %s229_s29 = scalar_lea.sflag (!%p1295_p1), [#allocation3], %s1195_s26  ;;  %s232_s6 = scalar_lea.vmem (!%p1295_p1), [#allocation2], %s1198_s10 }
  0x85   : > { %928 = dma.done.wait (%p1296_p8), %s229_s29, 256  }
  0x86   : > { %930 = vsyncadd (%p1296_p8), %s229_s29, 4294967040  ;;  %s237_s23 = sand.u32 1, %s1016_s19   ;;  %s241_s7 = scalar_lea.vmem [#allocation5], %s1198_s10 }
  0x87   : > { %s238_s5 = scalar_lea.sflag [#allocation6], %s237_s23 }
  0x88   : > { %932 = dma.done.wait (%p1296_p8), %s238_s5, 256  }
  0x89   : > { %934 = vsyncadd (%p1296_p8), %s238_s5, 4294967040  ;;  %p1297_p11 = scmp.eq.s32.totalorder %s1016_s19, 0 }
  0x8b   : > { %936 = dma.done.wait (%p1297_p11), [#allocation6], 8192   ;;  %p1298_p0 = pmov %p1297_p11 }
  0x8d   : > { %938 = vsyncadd (%p1298_p0), [#allocation6], 4294959104  ;;  %p1299_p9 = pmov %p1298_p0 }
  0x8e   : > { %p1300_p12 = pmov %p1298_p0 }
  0x8f   : > { %940 = dma.done.wait (%p1299_p9), [#allocation9], 256  }
  0x90   : > { %942 = vsyncadd (%p1300_p12), [#allocation9], 4294967040  ;;  %v282_v0 = vld [vmem:[#allocation7 + $0x8] sm:$0xff]  ;;  %v284_v1 = vld [vmem:[#allocation7 + $0x18] sm:$0xff]  ;;  %s626_s21 = sshll.u32 %s1016_s19, 8  ;;  %s278_s20 = scalar_lea.vmem [#allocation10], %s1198_s10 }
  0x91   : > { %v281_v2 = vld [vmem:[#allocation7] sm:$0xff]  ;;  %v627_v3 = vpack.c.bf16 %v284_v1, %v282_v0  ;;  %v283_v4 = vld [vmem:[#allocation7 + $0x10] sm:$0xff]  ;;  %v286_v5 = vld [vmem:[#allocation7 + $0x28] sm:$0xff]  ;;  %s490_s24 = sshll.u32 %s278_s20, 4  ;;  %s1233_s25 = scalar_lea.hbm %s1281_s4, %s626_s21  ;;  %s1235_s24 = int_to_ptr.vmem [resolvable:$true] %s490_s24 }
  0x92   : > { %v288_v6 = vld [vmem:[#allocation7 + $0x38] sm:$0xff]  ;;  %v629_v7 = vpack.c.bf16 %v283_v4, %v281_v2  ;;  %v285_v9 = vld [vmem:[#allocation7 + $0x20] sm:$0xff]  ;;  %v287_v10 = vld [vmem:[#allocation7 + $0x30] sm:$0xff]  ;;  %s476_s2 = scalar_lea.sflag [#allocation4], %s1195_s26  ;;  %s883_s19 = scalar_lea.vmem %s1235_s24, 256 }
  0x93   : > { %v631_v8 = vpack.c.bf16 %v288_v6, %v286_v5  ;;  %v290_v11 = vld [vmem:[#allocation7 + $0x48] sm:$0xff]  ;;  %628 = vmatprep.subr.bf16.mxu0 %v627_v3  ;;  %v292_v12 = vld [vmem:[#allocation7 + $0x58] sm:$0xff]  ;;  %v633_v13 = vpack.c.bf16 %v287_v10, %v285_v9  ;;  %v289_v15 = vld [vmem:[#allocation7 + $0x40] sm:$0xff]  ;;  %p884_p2 = scmp.ne.s32.totalorder %s1235_s24, %s883_s19  ;;  %p1301_p13 = scmp.ne.s32.totalorder %s1293_s11, 0 }
  0x94   : > { %630 = vmatpush1.bf16.msra.mxu0 %v629_v7  ;;  %v635_v14 = vpack.c.bf16 %v292_v12, %v290_v11  ;;  %v291_v16 = vld [vmem:[#allocation7 + $0x50] sm:$0xff]  ;;  %v294_v17 = vld [vmem:[#allocation7 + $0x68] sm:$0xff]  ;;  %v296_v18 = vld [vmem:[#allocation7 + $0x78] sm:$0xff]  ;;  %s969_s28 = smov [#allocation10]  }
  0x95   : > { %632 = vmatprep.subr.bf16.mxu0 %v631_v8  ;;  %v637_v19 = vpack.c.bf16 %v291_v16, %v289_v15  ;;  %v639_v20 = vpack.c.bf16 %v296_v18, %v294_v17  ;;  %v293_v21 = vld [vmem:[#allocation7 + $0x60] sm:$0xff]  ;;  %v295_v22 = vld [vmem:[#allocation7 + $0x70] sm:$0xff]  ;;  %v298_v23 = vld [vmem:[#allocation7 + $0x88] sm:$0xff]  ;;  %p885_p6 = pnand %p884_p2, %p1301_p13  ;;  %s887_s27 = sshll.u32 %s969_s28, 4  ;;  %s888_s27 = int_to_ptr.vmem [resolvable:$false] %s887_s27 }
  0x96   : > { %v300_v24 = vld [vmem:[#allocation7 + $0x98] sm:$0xff]  ;;  %v641_v25 = vpack.c.bf16 %v295_v22, %v293_v21  ;;  %v297_v27 = vld [vmem:[#allocation7 + $0x80] sm:$0xff]  ;;  %v299_v28 = vld [vmem:[#allocation7 + $0x90] sm:$0xff]  ;;  %s889_s30 = scalar_lea.vmem %s888_s27, 512  ;;  %p890_p4 = scmp.lt.s32.totalorder %s1235_s24, %s888_s27 }
  0x97   : > { %v643_v26 = vpack.c.bf16 %v300_v24, %v298_v23  ;;  %v302_v29 = vld [vmem:[#allocation7 + $0xa8] sm:$0xff]  ;;  %v304_v30 = vld [vmem:[#allocation7 + $0xb8] sm:$0xff]  ;;  %v645_v31 = vpack.c.bf16 %v299_v28, %v297_v27  ;;  %v301_v33 = vld [vmem:[#allocation7 + $0xa0] sm:$0xff]  ;;  %p886_p10 = pneg %p885_p6  ;;  %p891_p5 = scmp.lt.s32.totalorder %s889_s30, %s883_s19 }
  0x98   : > { %634 = vmatpush1.bf16.msra.mxu0 %v633_v13  ;;  %v647_v32 = vpack.c.bf16 %v304_v30, %v302_v29  ;;  %v303_v34 = vld [vmem:[#allocation7 + $0xb0] sm:$0xff]  ;;  %v306_v35 = vld [vmem:[#allocation7 + $0xc8] sm:$0xff]  ;;  %v308_v36 = vld [vmem:[#allocation7 + $0xd8] sm:$0xff] }
  0x99   : > { %636 = vmatprep.subr.bf16.mxu0 %v635_v14  ;;  %v649_v37 = vpack.c.bf16 %v303_v34, %v301_v33  ;;  %v651_v38 = vpack.c.bf16 %v308_v36, %v306_v35  ;;  %v305_v39 = vld [vmem:[#allocation7 + $0xc0] sm:$0xff]  ;;  %v307_v40 = vld [vmem:[#allocation7 + $0xd0] sm:$0xff]  ;;  %v280_v41 = vld [vmem:[%s232_s6 + $0x8] sm:$0xff]  ;;  %v347_v34 = vlaneseq  ;;  %p892_p3 = por %p891_p5, %p890_p4 }
  0x9a   : > { %v310_v42 = vld [vmem:[#allocation7 + $0xe8] sm:$0xff]  ;;  %v312_v43 = vld [vmem:[#allocation7 + $0xf8] sm:$0xff]  ;;  %419 = vmatprep.mubr.f32.mxu0 %v280_v41  ;;  %v653_v44 = vpack.c.bf16 %v307_v40, %v305_v39  ;;  %v309_v46 = vld [vmem:[#allocation7 + $0xe0] sm:$0xff] }
  0x9b   : > { %v655_v45 = vpack.c.bf16 %v312_v43, %v310_v42  ;;  %v311_v47 = vld [vmem:[#allocation7 + $0xf0] sm:$0xff]  ;;  %v314_v48 = vld [vmem:[#allocation7 + $0x108] sm:$0xff]  ;;  %v316_v49 = vld [vmem:[#allocation7 + $0x118] sm:$0xff]  ;;  %v348_v35 = vshrl.u32 %v347_v34, 7  ;;  %p893_p7 = pnand %p892_p3, %p886_p10 }
  0x9c   : > { %638 = vmatpush1.bf16.msra.mxu0 %v637_v19  ;;  %v657_v50 = vpack.c.bf16 %v311_v47, %v309_v46  ;;  %v659_v51 = vpack.c.bf16 %v316_v49, %v314_v48  ;;  %v313_v52 = vld [vmem:[#allocation7 + $0x100] sm:$0xff]  ;;  %v315_v53 = vld [vmem:[#allocation7 + $0x110] sm:$0xff]  ;;  %v318_v54 = vld [vmem:[#allocation7 + $0x128] sm:$0xff] }
  0x9d   : > { %640 = vmatprep.subr.bf16.mxu0 %v639_v20  ;;  %v320_v55 = vld [vmem:[#allocation7 + $0x138] sm:$0xff]  ;;  %v661_v56 = vpack.c.bf16 %v315_v53, %v313_v52  ;;  %v317_v58 = vld [vmem:[#allocation7 + $0x120] sm:$0xff]  ;;  %v319_v59 = vld [vmem:[#allocation7 + $0x130] sm:$0xff]  ;;  %v349_v36 = vsub.s32 0, %v348_v35 }
  0x9e   : > { %v663_v57 = vpack.c.bf16 %v320_v55, %v318_v54  ;;  %v322_v60 = vld [vmem:[#allocation7 + $0x148] sm:$0xff]  ;;  %v324_v61 = vld [vmem:[#allocation7 + $0x158] sm:$0xff]  ;;  %v665_v62 = vpack.c.bf16 %v319_v59, %v317_v58  ;;  %v321_v0 = vld [vmem:[#allocation7 + $0x140] sm:$0xff]  ;;  %v455_v59 = vsub.s32 1, %v348_v35 }
  0x9f   : > { %v667_v63 = vpack.c.bf16 %v324_v61, %v322_v60  ;;  %v323_v1 = vld [vmem:[#allocation7 + $0x150] sm:$0xff]  ;;  %v326_v2 = vld [vmem:[#allocation7 + $0x168] sm:$0xff]  ;;  %v328_v3 = vld [vmem:[#allocation7 + $0x178] sm:$0xff]  ;;  %v465_v60 = vsub.s32 2, %v348_v35 }
  0xa0   : > { %642 = vmatpush1.bf16.msra.mxu0 %v641_v25  ;;  %v669_v4 = vpack.c.bf16 %v323_v1, %v321_v0  ;;  %v671_v5 = vpack.c.bf16 %v328_v3, %v326_v2  ;;  %v325_v6 = vld [vmem:[#allocation7 + $0x160] sm:$0xff]  ;;  %v327_v7 = vld [vmem:[#allocation7 + $0x170] sm:$0xff]  ;;  %v330_v8 = vld [vmem:[#allocation7 + $0x188] sm:$0xff] }
  0xa1   : > { %644 = vmatprep.subr.bf16.mxu0 %v643_v26  ;;  %v332_v9 = vld [vmem:[#allocation7 + $0x198] sm:$0xff]  ;;  %v673_v10 = vpack.c.bf16 %v327_v7, %v325_v6  ;;  %v329_v12 = vld [vmem:[#allocation7 + $0x180] sm:$0xff]  ;;  %v331_v13 = vld [vmem:[#allocation7 + $0x190] sm:$0xff] }
  0xa2   : > { %v675_v11 = vpack.c.bf16 %v332_v9, %v330_v8  ;;  %v334_v14 = vld [vmem:[#allocation7 + $0x1a8] sm:$0xff]  ;;  %v336_v15 = vld [vmem:[#allocation7 + $0x1b8] sm:$0xff]  ;;  %v677_v16 = vpack.c.bf16 %v331_v13, %v329_v12  ;;  %v333_v18 = vld [vmem:[#allocation7 + $0x1a0] sm:$0xff] }
  0xa3   : > { %v679_v17 = vpack.c.bf16 %v336_v15, %v334_v14  ;;  %v335_v19 = vld [vmem:[#allocation7 + $0x1b0] sm:$0xff]  ;;  %v338_v20 = vld [vmem:[#allocation7 + $0x1c8] sm:$0xff]  ;;  %v340_v21 = vld [vmem:[#allocation7 + $0x1d8] sm:$0xff] }
  0xa4   : > { %646 = vmatpush1.bf16.msra.mxu0 %v645_v31  ;;  %v681_v22 = vpack.c.bf16 %v335_v19, %v333_v18  ;;  %v683_v23 = vpack.c.bf16 %v340_v21, %v338_v20  ;;  %v337_v24 = vld [vmem:[#allocation7 + $0x1c0] sm:$0xff]  ;;  %v339_v25 = vld [vmem:[#allocation7 + $0x1d0] sm:$0xff]  ;;  %v342_v26 = vld [vmem:[#allocation7 + $0x1e8] sm:$0xff] }
  0xa5   : > { %648 = vmatprep.subr.bf16.mxu0 %v647_v32  ;;  %v344_v27 = vld [vmem:[#allocation7 + $0x1f8] sm:$0xff]  ;;  %v685_v28 = vpack.c.bf16 %v339_v25, %v337_v24  ;;  %v341_v30 = vld [vmem:[#allocation7 + $0x1e0] sm:$0xff]  ;;  %v343_v31 = vld [vmem:[#allocation7 + $0x1f0] sm:$0xff] }
  0xa6   : > { %v687_v29 = vpack.c.bf16 %v344_v27, %v342_v26  ;;  %v689_v32 = vpack.c.bf16 %v343_v31, %v341_v30  ;;  %v279_v33 = vld [vmem:[%s232_s6] sm:$0xff] }
  0xa7   : > { %v426_v42 = vld [vmem:[%s241_s7] sm:$0xff] }
  0xa8   : > { %650 = vmatpush1.bf16.msra.mxu0 %v649_v37  ;;  %v345_v37 = vld [vmem:[#allocation8] sm:$0xff] }
  0xa9   : > { %652 = vmatprep.subr.bf16.mxu0 %v651_v38  ;;  %v346_v38 = vld [vmem:[#allocation8 + $0x8] sm:$0xff]  ;;  %v350_v39 = vrot.slane %v345_v37, %v349_v36  ;;  %v456_v61 = vrot.slane %v345_v37, %v455_v59  ;;  %v466_v0 = vrot.slane %v345_v37, %v465_v60 }
  0xaa   : > { %v354_v40 = vrot.slane %v346_v38, %v349_v36  ;;  %v470_v1 = vrot.slane %v346_v38, %v465_v60 }
  0xac   : > { %654 = vmatpush1.bf16.msra.mxu0 %v653_v44 }
  0xad   : > { %656 = vmatprep.subr.bf16.mxu0 %v655_v45  ;;  %v427_v45 = vld [vmem:[%s241_s7 + $0x8] sm:$0xff] }
  0xb0   : > { %658 = vmatpush1.bf16.msra.mxu0 %v657_v50  ;;  %v437_v50 = vand.u32 127, %v347_v34 }
  0xb1   : > { %660 = vmatprep.subr.bf16.mxu0 %v659_v51 }
  0xb2   : > { %vm439_vm0 = vcmp.lt.s32.totalorder %v437_v50, 32 }
  0xb4   : > { %662 = vmatpush1.bf16.msra.mxu0 %v661_v56 }
  0xb5   : > { %664 = vmatprep.subr.bf16.mxu0 %v663_v57 }
  0xb8   : > { %666 = vmatpush1.bf16.msra.mxu0 %v665_v62  ;;  %v460_v62 = vrot.slane %v346_v38, %v455_v59 }
  0xb9   : > { %668 = vmatprep.subr.bf16.mxu0 %v667_v63 }
  0xbc   : > { %670 = vmatpush1.bf16.msra.mxu0 %v669_v4 }
  0xbd   : > { %672 = vmatprep.subr.bf16.mxu0 %v671_v5 }
  0xc0   : > { %674 = vmatpush1.bf16.msra.mxu0 %v673_v10 }
  0xc1   : > { %676 = vmatprep.subr.bf16.mxu0 %v675_v11 }
  0xc4   : > { %678 = vmatpush1.bf16.msra.mxu0 %v677_v16 }
  0xc5   : > { %680 = vmatprep.subr.bf16.mxu0 %v679_v17 }
  0xc8   : > { %682 = vmatpush1.bf16.msra.mxu0 %v681_v22 }
  0xc9   : > { %684 = vmatprep.subr.bf16.mxu0 %v683_v23 }
  0xcc   : > { %686 = vmatpush1.bf16.msra.mxu0 %v685_v28 }
  0xcd   : > { %688 = vmatprep.subr.bf16.mxu0 %v687_v29 }
  0xd0   : > { %690 = vmatpush1.bf16.msra.mxu0 %v689_v32 }
  0xd3   : > { %420 = vmatmul.mubr.f32.vlgmr.msra.gmra.mrb[0].mxu0 %v279_v33 }
 0x1a6   : > { %v421_v41 = vpop.f32.mrb[0].mxu0 }
 0x1a7   : > { %v422_v43 = vadd.f32 %v421_v41, %v350_v39  ;;  %v423_v44 = vpop.f32.mrb[1].mxu0 }
 0x1a8   : > { %v424_v46 = vadd.f32 %v423_v44, %v354_v40 }
 0x1a9   : > { %v428_v47 = vadd.f32 %v426_v42, %v422_v43 }
 0x1aa   : > { %v429_v48 = vadd.f32 %v427_v45, %v424_v46 }
 0x1ac   : > { %v430_v49 = vadd.f32 %v429_v48, %v428_v47 }
 0x1ae   : > { %431 = vadd.xlane.f32.xlu0 %v430_v49 }
 0x23b   : > { %v432_v51 = vpop.xlane.xlu0 %431 }
 0x23c   : > { %v433_v52 = vmul.f32 0.03125, %v432_v51 }
 0x23e   : > { %v434_v53 = vsub.f32 %v428_v47, %v433_v52 }
 0x240   : > { %v441_v54 = vsel %vm439_vm0, %v434_v53, 0.0 }
 0x241   : > { %v443_v55 = vmul.f32 %v441_v54, %v441_v54 }
 0x243   : > { %446 = vadd.xlane.f32.xlu0 %v443_v55 }
 0x2d0   : > { %v447_v56 = vpop.xlane.xlu0 %446 }
 0x2d1   : > { %v448_v57 = vmul.f32 0.03125, %v447_v56 }
 0x2d3   : > { %v449_v58 = vadd.f32 1e-12, %v448_v57 }
 0x2d5   : > { %765 = vrsqrt.f32 %v449_v58 }
 0x2df   : > { %v766_v63 = vpop.eup %765 }
 0x2e0   : > { %v451_v2 = vmul.f32 %v766_v63, %v441_v54  ;;  %v452_v3 = vmul.f32 0.0, %v766_v63 }
 0x2e2   : > { %v461_v4 = vmul.f32 %v456_v61, %v451_v2  ;;  %v462_v5 = vmul.f32 %v460_v62, %v452_v3 }
 0x2e4   : > { %v471_v6 = vadd.f32 %v466_v0, %v461_v4  ;;  %v472_v7 = vadd.f32 %v470_v1, %v462_v5 }
 0x2e6   : > { %473 = vst [vmem:[%s278_s20] sm:$0xff] %v471_v6  ;;  %474 = vst [vmem:[%s278_s20 + $0x8] sm:$0xff] %v472_v7 }
 0x2e7   : > { %896 = shalt.err (!%p893_p7)
}
 0x2e8   : > { %s897_s8 = scalar_lea.hbm %s1233_s25, 256  ;;  %s901_s29 = scalar_lea.hbm %s1281_s4, 512 }
 0x2e9   : > { %p898_p1 = scmp.ne.s32.totalorder %s1233_s25, %s897_s8  ;;  %p902_p0 = scmp.lt.u32.totalorder %s1233_s25, %s1281_s4 }
 0x2ea   : > { %p903_p9 = scmp.lt.u32.totalorder %s901_s29, %s897_s8  ;;  %p905_p2 = scmp.lt.u32.totalorder %s897_s8, %s1233_s25 }
 0x2eb   : > { %p899_p8 = pnand %p898_p1, %p1301_p13 }
 0x2ec   : > { %p904_p12 = por %p903_p9, %p902_p0 }
 0x2ed   : > { %p900_p11 = pneg %p899_p8 }
 0x2ee   : > { %p906_p6 = por %p905_p2, %p904_p12 }
 0x2f0   : > { %p907_p10 = pnand %p906_p6, %p900_p11 }
 0x2f2   : > { %910 = shalt.err (!%p907_p10)
}
 0x2f3   : > { %703 = dma.vmem_to_hbm [thread:$0]  (%p1301_p13), %s1235_s24, 256, %s1233_s25, %s476_s2  }
 0x2f4 PF: > { %s502_s5 = sand.u32 1, %s949_s15   ;;  %p1302_p4 = scmp.ne.s32.totalorder %s1288_s22, 0 }
 0x2f5   : > { %p1303_p5 = scmp.ge.s32.totalorder %s961_s18, 2  ;;  %s503_s7 = scalar_lea.sflag [#allocation4], %s502_s5 }
 0x2f7   : > { %p720_p3 = pnand %p1303_p5, %p1302_p4 }
 0x2f9   : > { %944 = dma.done.wait (!%p720_p3), %s503_s7, 256  }
 0x2fa   : > { %946 = vsyncadd (!%p720_p3), %s503_s7, 4294967040  ;;  %p21_p7 = scmp.ge.s32.totalorder %s1105_s9, 4   ;;  %s1304_s15 = smov %s953_s16 }
 0x2fb   : > { %s1305_s16 = smov %s957_s17  ;;  %s1306_s17 = smov %s1121_s12 }
 0x2fc   : > { %s1307_s18 = smov %s1105_s9  ;;  %23 = sbr.rel (!%p21_p7) target bundleno = 10 (0xa), region = 102 }
 0x303   :  { %508 = vsyncpa [#allocation3], 1 }
 0x304   :  { %510 = vsyncpa [#allocation3 + $0x1], 1 }
 0x305   :  { %511 = vsyncpa [#allocation6], 1 }
 0x306   :  { %513 = vsyncpa [#allocation6 + $0x1], 1 }
 0x307   :  { %514 = vsyncpa [#allocation9], 1 }
 0x308   :  { %515 = vsyncpa [#allocation4], 1 }
 0x309   :  { %517 = vsyncpa [#allocation4 + $0x1], 1 }

// kernel: tpu_custom_call.1
= control target key start
LH: loop header
LB: loop body
LE: loop exit
PB: predicated region body
PF: predicated region fallthrough
CT: control target
= control target key end

     0   :  { %s1277_s0 = inlined_call_operand.hbm [shape: f32[16,256], index: 0, kind: input, shape index: {}]   ;;  %s1278_s1 = inlined_call_operand.hbm [shape: f32[16,256], index: 1, kind: input, shape index: {}]   ;;  %s1279_s2 = inlined_call_operand.hbm [shape: f32[256,256], index: 2, kind: input, shape index: {}]   ;;  %s1280_s3 = inlined_call_operand.hbm [shape: f32[8,256], index: 3, kind: input, shape index: {}]   ;;  %s1281_s4 = inlined_call_operand.hbm [shape: f32[16,256], index: 4, kind: output, shape index: {}]  }
   0x1   :  { %1286 = sst [smem:[#allocation16_spill]] %s1279_s2 }
   0x2   :  { %9 = vsyncpa [#allocation3], 0 }
   0x3   :  { %11 = vsyncpa [#allocation3 + $0x1], 0 }
   0x4   :  { %12 = vsyncpa [#allocation6], 0 }
   0x5   :  { %14 = vsyncpa [#allocation6 + $0x1], 0 }
   0x6   :  { %15 = vsyncpa [#allocation9], 0 }
   0x7   :  { %16 = vsyncpa [#allocation4], 0 }
   0x8   :  { %18 = vsyncpa [#allocation4 + $0x1], 0  ;;  %s995_s15 = smov 0   ;;  %s997_s16 = smov 0  }
   0x9   :  { %s999_s17 = smov 0   ;;  %s1001_s18 = smov 0  }
   0xa LB: > { %s1016_s19 = sadd.s32 4294967295, %s961_s18   ;;  %s602_s20 = sadd.s32 4294967294, %s961_s18   ;;  %s961_s18 = sphi %s1001_s18, %s1307_s18   ;;  %s957_s17 = sphi %s999_s17, %s1306_s17   ;;  %s953_s16 = sphi %s997_s16, %s1305_s16   ;;  %s949_s15 = sphi %s995_s15, %s1304_s15  }
   0xb   : > { %p44_p0 = scmp.ne.s32.totalorder %s953_s16, %s949_s15  ;;  %p1282_p1 = scmp.eq.s32.totalorder %s1016_s19, 0 }
   0xc   : > { %p142_p3 = scmp.eq.s32.totalorder %s602_s20, 1  ;;  %p603_p5 = scmp.ge.s32.totalorder %s961_s18, 1 }
   0xd   : > { %p1025_p4 = por %p1282_p1, %p44_p0  ;;  %p149_p7 = scmp.lt.s32.totalorder %s961_s18, 3 }
   0xe   : > { %p1030_p6 = por %p142_p3, %p44_p0  ;;  %s963_s24 = smov [#allocation7]  }
   0xf   : > { %s1287_s21 = scalar_select %p1025_p4, 1, 0 }
  0x10   : > { %s1288_s22 = scalar_select %p1030_p6, 1, 0 }
  0x11   : > { %p1035_p8 = pnand %p603_p5, %p149_p7  ;;  %s161_s25 = sshll.u32 %s963_s24, 4  ;;  %s1039_s25 = int_to_ptr.vmem [resolvable:$true] %s161_s25 }
  0x12   : > { %s964_s27 = smov [#allocation8]   ;;  %s1291_s2 = sld [smem:[#allocation16_spill]] }
  0x13   : > { %s1289_s23 = scalar_select %p1035_p8, 1, 0 }
  0x14   : > { %p705_p9 = pneg %p1035_p8  ;;  %s175_s28 = sshll.u32 %s964_s27, 4  ;;  %s1050_s28 = int_to_ptr.vmem [resolvable:$true] %s175_s28 }
  0x16   : > { %p1046_p11 = pnand %p705_p9, %p1282_p1 }
  0x18   : > { %s767_s5 = scalar_lea.hbm %s1291_s2, 8192  ;;  %p769_p13 = pneg %p1046_p11 }
  0x19   : > { %p768_p12 = scmp.ne.s32.totalorder %s1291_s2, %s767_s5  ;;  %p774_p5 = scmp.lt.u32.totalorder %s767_s5, %s1291_s2 }
  0x1b   : > { %p770_p0 = pnand %p769_p13, %p768_p12 }
  0x1d   : > { %p771_p3 = pneg %p770_p0 }
  0x1f   : > { %p776_p7 = pnand %p774_p5, %p771_p3 }
  0x21   : > { %779 = shalt.err (!%p776_p7)
}
  0x22   : > { %s780_s10 = scalar_lea.vmem %s1039_s25, 8192  ;;  %p788_p2 = scmp.lt.s32.totalorder %s1039_s25, %s1039_s25 }
  0x23   : > { %p781_p9 = scmp.ne.s32.totalorder %s1039_s25, %s780_s10  ;;  %p789_p12 = scmp.lt.s32.totalorder %s780_s10, %s780_s10 }
  0x25   : > { %p783_p10 = pnand %p781_p9, %p769_p13  ;;  %p790_p0 = por %p789_p12, %p788_p2 }
  0x27   : > { %p784_p1 = pneg %p783_p10 }
  0x29   : > { %p791_p6 = pnand %p790_p0, %p784_p1 }
  0x2b   : > { %794 = shalt.err (!%p791_p6)
}
  0x2c   : > { %s965_s11 = smov 256   ;;  %s966_s12 = smov 16  }
  0x2d   : > { %708 = dma.hbm_to_vmem [thread:$0]  (!%p1046_p11), %s1291_s2, 8192, %s1039_s25, [#allocation6], %s965_s11, %s965_s11, %s966_s12  }
  0x2e   : > { %s795_s27 = scalar_lea.hbm %s1280_s3, 256 }
  0x2f   : > { %p796_p2 = scmp.ne.s32.totalorder %s1280_s3, %s795_s27  ;;  %p802_p10 = scmp.lt.u32.totalorder %s795_s27, %s1280_s3 }
  0x31   : > { %p798_p1 = pnand %p796_p2, %p769_p13 }
  0x33   : > { %p799_p6 = pneg %p798_p1 }
  0x35   : > { %p804_p3 = pnand %p802_p10, %p799_p6 }
  0x37   : > { %807 = shalt.err (!%p804_p3)
}
  0x38   : > { %s808_s25 = scalar_lea.vmem %s1050_s28, 256  ;;  %p816_p12 = scmp.lt.s32.totalorder %s1050_s28, %s1050_s28 }
  0x39   : > { %p809_p5 = scmp.ne.s32.totalorder %s1050_s28, %s808_s25  ;;  %p817_p0 = scmp.lt.s32.totalorder %s808_s25, %s808_s25 }
  0x3b   : > { %p811_p7 = pnand %p809_p5, %p769_p13  ;;  %p818_p2 = por %p817_p0, %p816_p12 }
  0x3d   : > { %p812_p9 = pneg %p811_p7 }
  0x3f   : > { %p819_p1 = pnand %p818_p2, %p812_p9 }
  0x41   : > { %822 = shalt.err (!%p819_p1)
}
  0x42   : > { %711 = dma.hbm_to_vmem [thread:$0]  (!%p1046_p11), %s1280_s3, 256, %s1050_s28, [#allocation9]  }
  0x43   : > { %s1105_s9 = sadd.s32 1, %s961_s18   ;;  %s31_s26 = sadd.s32 1, %s957_s17 }
  0x44   : > { %s28_s10 = ssub.s32 %s961_s18, %s1105_s9  ;;  %p38_p13 = scmp.ne.s32.totalorder %s957_s17, %s953_s16 }
  0x45   : > { %p29_p6 = scmp.eq.s32.totalorder %s28_s10, 0  ;;  %p39_p10 = scmp.eq.s32.totalorder %s961_s18, 0 }
  0x46   : > { %p1292_p3 = scmp.eq.s32.totalorder %s1016_s19, 1  ;;  %p725_p7 = scmp.lt.s32.totalorder %s961_s18, 2 }
  0x47   : > { %s1121_s12 = scalar_select %p29_p6, %s957_s17, %s31_s26  }
  0x48   : > { %p1115_p5 = por %p1292_p3, %p38_p13  ;;  %p40_p9 = por %p39_p10, %p38_p13 }
  0x49   : > { %s186_s13 = sand.u32 1, %s957_s17   ;;  %s624_s14 = sshll.u32 %s961_s18, 8 }
  0x4a   : > { %s1293_s11 = scalar_select %p1115_p5, 1, 0 }
  0x4b   : > { %s1124_s28 = sshll.u32 %s186_s13, 4  ;;  %s1130_s27 = scalar_lea.hbm %s1277_s0, %s624_s14 }
  0x4c   : > { %s190_s29 = scalar_lea.vmem [#allocation2], %s1124_s28  ;;  %p1135_p11 = pnand %p725_p7, %p40_p9 }
  0x4d   : > { %s198_s30 = sshll.u32 %s190_s29, 4  ;;  %s1142_s7 = scalar_lea.hbm %s1278_s1, %s624_s14  ;;  %s1133_s30 = int_to_ptr.vmem [resolvable:$true] %s198_s30 }
  0x4e   : > { %s205_s8 = sand.u32 1, %s961_s18   ;;  %s187_s26 = scalar_lea.sflag [#allocation3], %s186_s13 }
  0x4f   : > { %s823_s10 = scalar_lea.hbm %s1130_s27, 256  ;;  %p825_p0 = pneg %p1135_p11 }
  0x50   : > { %p824_p12 = scmp.ne.s32.totalorder %s1130_s27, %s823_s10  ;;  %s828_s29 = scalar_lea.hbm %s1277_s0, 512 }
  0x51   : > { %p829_p13 = scmp.lt.u32.totalorder %s1130_s27, %s1277_s0  ;;  %p830_p6 = scmp.lt.u32.totalorder %s828_s29, %s823_s10 }
  0x52   : > { %p826_p2 = pnand %p825_p0, %p824_p12  ;;  %p832_p3 = scmp.lt.u32.totalorder %s823_s10, %s1130_s27 }
  0x53   : > { %p831_p10 = por %p830_p6, %p829_p13 }
  0x54   : > { %p827_p1 = pneg %p826_p2 }
  0x55   : > { %p833_p7 = por %p832_p3, %p831_p10 }
  0x57   : > { %p834_p9 = pnand %p833_p7, %p827_p1 }
  0x59   : > { %837 = shalt.err (!%p834_p9)
}
  0x5a   : > { %s838_s13 = scalar_lea.vmem %s1133_s30, 256  ;;  %s967_s14 = smov [#allocation2]  }
  0x5b   : > { %p839_p12 = scmp.ne.s32.totalorder %s1133_s30, %s838_s13  ;;  %s843_s25 = sshll.u32 %s967_s14, 4  ;;  %s844_s25 = int_to_ptr.vmem [resolvable:$false] %s843_s25 }
  0x5c   : > { %s845_s2 = scalar_lea.vmem %s844_s25, 512  ;;  %p846_p4 = scmp.lt.s32.totalorder %s1133_s30, %s844_s25 }
  0x5d   : > { %p841_p2 = pnand %p839_p12, %p825_p0  ;;  %p847_p13 = scmp.lt.s32.totalorder %s845_s2, %s838_s13 }
  0x5f   : > { %p842_p5 = pneg %p841_p2  ;;  %p848_p6 = por %p847_p13, %p846_p4 }
  0x61   : > { %p849_p10 = pnand %p848_p6, %p842_p5 }
  0x63   : > { %852 = shalt.err (!%p849_p10)
}
  0x64   : > { %715 = dma.hbm_to_vmem [thread:$0]  (!%p1135_p11), %s1130_s27, 256, %s1133_s30, %s187_s26  }
  0x65   : > { %s209_s10 = scalar_lea.vmem [#allocation5], %s1124_s28  ;;  %s206_s24 = scalar_lea.sflag [#allocation6], %s205_s8 }
  0x66   : > { %s217_s20 = sshll.u32 %s209_s10, 4  ;;  %s853_s29 = scalar_lea.hbm %s1142_s7, 256  ;;  %s218_s20 = int_to_ptr.vmem [resolvable:$true] %s217_s20 }
  0x67   : > { %p854_p4 = scmp.ne.s32.totalorder %s1142_s7, %s853_s29  ;;  %s858_s14 = scalar_lea.hbm %s1278_s1, 512 }
  0x68   : > { %p859_p3 = scmp.lt.u32.totalorder %s1142_s7, %s1278_s1  ;;  %p860_p7 = scmp.lt.u32.totalorder %s858_s14, %s853_s29 }
  0x69   : > { %p856_p5 = pnand %p854_p4, %p825_p0  ;;  %p862_p12 = scmp.lt.u32.totalorder %s853_s29, %s1142_s7 }
  0x6a   : > { %p861_p9 = por %p860_p7, %p859_p3 }
  0x6b   : > { %p857_p1 = pneg %p856_p5 }
  0x6c   : > { %p863_p2 = por %p862_p12, %p861_p9 }
  0x6e   : > { %p864_p13 = pnand %p863_p2, %p857_p1 }
  0x70   : > { %867 = shalt.err (!%p864_p13)
}
  0x71   : > { %s868_s28 = scalar_lea.vmem %s218_s20, 256  ;;  %s968_s27 = smov [#allocation5]  }
  0x72   : > { %p869_p6 = scmp.ne.s32.totalorder %s218_s20, %s868_s28  ;;  %s873_s30 = sshll.u32 %s968_s27, 4  ;;  %s874_s30 = int_to_ptr.vmem [resolvable:$false] %s873_s30 }
  0x73   : > { %s875_s8 = scalar_lea.vmem %s874_s30, 512  ;;  %p876_p5 = scmp.lt.s32.totalorder %s218_s20, %s874_s30 }
  0x74   : > { %p871_p10 = pnand %p869_p6, %p825_p0  ;;  %p877_p8 = scmp.lt.s32.totalorder %s875_s8, %s868_s28 }
  0x76   : > { %p872_p4 = pneg %p871_p10  ;;  %p878_p3 = por %p877_p8, %p876_p5 }
  0x78   : > { %p879_p7 = pnand %p878_p3, %p872_p4 }
  0x7a   : > { %882 = shalt.err (!%p879_p7)
}
  0x7b   : > { %718 = dma.hbm_to_vmem [thread:$0]  (!%p1135_p11), %s1142_s7, 256, %s218_s20, %s206_s24  }
  0x7c   : > { %p1295_p1 = scmp.ne.s32.totalorder %s1289_s23, 0 }
  0x7d   : > { %s1195_s26 = sand.u32 (!%p1295_p1), 1, %s953_s16   ;;  %p1296_p8 = scmp.ne.s32.totalorder (!%p1295_p1), %s1287_s21, 0 }
  0x7e   : > { %226 = sbr.rel (%p1295_p1) target bundleno = 756 (0x2f4), region = 36  ;;  %s1198_s10 = sshll.u32 (!%p1295_p1), %s1195_s26, 4 }
  0x7f   : > { %s229_s29 = scalar_lea.sflag (!%p1295_p1), [#allocation3], %s1195_s26  ;;  %s232_s6 = scalar_lea.vmem (!%p1295_p1), [#allocation2], %s1198_s10 }
  0x85   : > { %928 = dma.done.wait (%p1296_p8), %s229_s29, 256  }
  0x86   : > { %930 = vsyncadd (%p1296_p8), %s229_s29, 4294967040  ;;  %s237_s23 = sand.u32 1, %s1016_s19   ;;  %s241_s7 = scalar_lea.vmem [#allocation5], %s1198_s10 }
  0x87   : > { %s238_s5 = scalar_lea.sflag [#allocation6], %s237_s23 }
  0x88   : > { %932 = dma.done.wait (%p1296_p8), %s238_s5, 256  }
  0x89   : > { %934 = vsyncadd (%p1296_p8), %s238_s5, 4294967040  ;;  %p1297_p11 = scmp.eq.s32.totalorder %s1016_s19, 0 }
  0x8b   : > { %936 = dma.done.wait (%p1297_p11), [#allocation6], 8192   ;;  %p1298_p0 = pmov %p1297_p11 }
  0x8d   : > { %938 = vsyncadd (%p1298_p0), [#allocation6], 4294959104  ;;  %p1299_p9 = pmov %p1298_p0 }
  0x8e   : > { %p1300_p12 = pmov %p1298_p0 }
  0x8f   : > { %940 = dma.done.wait (%p1299_p9), [#allocation9], 256  }
  0x90   : > { %942 = vsyncadd (%p1300_p12), [#allocation9], 4294967040  ;;  %v282_v0 = vld [vmem:[#allocation7 + $0x8] sm:$0xff]  ;;  %v284_v1 = vld [vmem:[#allocation7 + $0x18] sm:$0xff]  ;;  %s626_s21 = sshll.u32 %s1016_s19, 8  ;;  %s278_s20 = scalar_lea.vmem [#allocation10], %s1198_s10 }
  0x91   : > { %v281_v2 = vld [vmem:[#allocation7] sm:$0xff]  ;;  %v627_v3 = vpack.c.bf16 %v284_v1, %v282_v0  ;;  %v283_v4 = vld [vmem:[#allocation7 + $0x10] sm:$0xff]  ;;  %v286_v5 = vld [vmem:[#allocation7 + $0x28] sm:$0xff]  ;;  %s490_s24 = sshll.u32 %s278_s20, 4  ;;  %s1233_s25 = scalar_lea.hbm %s1281_s4, %s626_s21  ;;  %s1235_s24 = int_to_ptr.vmem [resolvable:$true] %s490_s24 }
  0x92   : > { %v288_v6 = vld [vmem:[#allocation7 + $0x38] sm:$0xff]  ;;  %v629_v7 = vpack.c.bf16 %v283_v4, %v281_v2  ;;  %v285_v9 = vld [vmem:[#allocation7 + $0x20] sm:$0xff]  ;;  %v287_v10 = vld [vmem:[#allocation7 + $0x30] sm:$0xff]  ;;  %s476_s2 = scalar_lea.sflag [#allocation4], %s1195_s26  ;;  %s883_s19 = scalar_lea.vmem %s1235_s24, 256 }
  0x93   : > { %v631_v8 = vpack.c.bf16 %v288_v6, %v286_v5  ;;  %v290_v11 = vld [vmem:[#allocation7 + $0x48] sm:$0xff]  ;;  %628 = vmatprep.subr.bf16.mxu0 %v627_v3  ;;  %v292_v12 = vld [vmem:[#allocation7 + $0x58] sm:$0xff]  ;;  %v633_v13 = vpack.c.bf16 %v287_v10, %v285_v9  ;;  %v289_v15 = vld [vmem:[#allocation7 + $0x40] sm:$0xff]  ;;  %p884_p2 = scmp.ne.s32.totalorder %s1235_s24, %s883_s19  ;;  %p1301_p13 = scmp.ne.s32.totalorder %s1293_s11, 0 }
  0x94   : > { %630 = vmatpush1.bf16.msra.mxu0 %v629_v7  ;;  %v635_v14 = vpack.c.bf16 %v292_v12, %v290_v11  ;;  %v291_v16 = vld [vmem:[#allocation7 + $0x50] sm:$0xff]  ;;  %v294_v17 = vld [vmem:[#allocation7 + $0x68] sm:$0xff]  ;;  %v296_v18 = vld [vmem:[#allocation7 + $0x78] sm:$0xff]  ;;  %s969_s28 = smov [#allocation10]  }
  0x95   : > { %632 = vmatprep.subr.bf16.mxu0 %v631_v8  ;;  %v637_v19 = vpack.c.bf16 %v291_v16, %v289_v15  ;;  %v639_v20 = vpack.c.bf16 %v296_v18, %v294_v17  ;;  %v293_v21 = vld [vmem:[#allocation7 + $0x60] sm:$0xff]  ;;  %v295_v22 = vld [vmem:[#allocation7 + $0x70] sm:$0xff]  ;;  %v298_v23 = vld [vmem:[#allocation7 + $0x88] sm:$0xff]  ;;  %p885_p6 = pnand %p884_p2, %p1301_p13  ;;  %s887_s27 = sshll.u32 %s969_s28, 4  ;;  %s888_s27 = int_to_ptr.vmem [resolvable:$false] %s887_s27 }
  0x96   : > { %v300_v24 = vld [vmem:[#allocation7 + $0x98] sm:$0xff]  ;;  %v641_v25 = vpack.c.bf16 %v295_v22, %v293_v21  ;;  %v297_v27 = vld [vmem:[#allocation7 + $0x80] sm:$0xff]  ;;  %v299_v28 = vld [vmem:[#allocation7 + $0x90] sm:$0xff]  ;;  %s889_s30 = scalar_lea.vmem %s888_s27, 512  ;;  %p890_p4 = scmp.lt.s32.totalorder %s1235_s24, %s888_s27 }
  0x97   : > { %v643_v26 = vpack.c.bf16 %v300_v24, %v298_v23  ;;  %v302_v29 = vld [vmem:[#allocation7 + $0xa8] sm:$0xff]  ;;  %v304_v30 = vld [vmem:[#allocation7 + $0xb8] sm:$0xff]  ;;  %v645_v31 = vpack.c.bf16 %v299_v28, %v297_v27  ;;  %v301_v33 = vld [vmem:[#allocation7 + $0xa0] sm:$0xff]  ;;  %p886_p10 = pneg %p885_p6  ;;  %p891_p5 = scmp.lt.s32.totalorder %s889_s30, %s883_s19 }
  0x98   : > { %634 = vmatpush1.bf16.msra.mxu0 %v633_v13  ;;  %v647_v32 = vpack.c.bf16 %v304_v30, %v302_v29  ;;  %v303_v34 = vld [vmem:[#allocation7 + $0xb0] sm:$0xff]  ;;  %v306_v35 = vld [vmem:[#allocation7 + $0xc8] sm:$0xff]  ;;  %v308_v36 = vld [vmem:[#allocation7 + $0xd8] sm:$0xff] }
  0x99   : > { %636 = vmatprep.subr.bf16.mxu0 %v635_v14  ;;  %v649_v37 = vpack.c.bf16 %v303_v34, %v301_v33  ;;  %v651_v38 = vpack.c.bf16 %v308_v36, %v306_v35  ;;  %v305_v39 = vld [vmem:[#allocation7 + $0xc0] sm:$0xff]  ;;  %v307_v40 = vld [vmem:[#allocation7 + $0xd0] sm:$0xff]  ;;  %v280_v41 = vld [vmem:[%s232_s6 + $0x8] sm:$0xff]  ;;  %v347_v34 = vlaneseq  ;;  %p892_p3 = por %p891_p5, %p890_p4 }
  0x9a   : > { %v310_v42 = vld [vmem:[#allocation7 + $0xe8] sm:$0xff]  ;;  %v312_v43 = vld [vmem:[#allocation7 + $0xf8] sm:$0xff]  ;;  %419 = vmatprep.mubr.f32.mxu0 %v280_v41  ;;  %v653_v44 = vpack.c.bf16 %v307_v40, %v305_v39  ;;  %v309_v46 = vld [vmem:[#allocation7 + $0xe0] sm:$0xff] }
  0x9b   : > { %v655_v45 = vpack.c.bf16 %v312_v43, %v310_v42  ;;  %v311_v47 = vld [vmem:[#allocation7 + $0xf0] sm:$0xff]  ;;  %v314_v48 = vld [vmem:[#allocation7 + $0x108] sm:$0xff]  ;;  %v316_v49 = vld [vmem:[#allocation7 + $0x118] sm:$0xff]  ;;  %v348_v35 = vshrl.u32 %v347_v34, 7  ;;  %p893_p7 = pnand %p892_p3, %p886_p10 }
  0x9c   : > { %638 = vmatpush1.bf16.msra.mxu0 %v637_v19  ;;  %v657_v50 = vpack.c.bf16 %v311_v47, %v309_v46  ;;  %v659_v51 = vpack.c.bf16 %v316_v49, %v314_v48  ;;  %v313_v52 = vld [vmem:[#allocation7 + $0x100] sm:$0xff]  ;;  %v315_v53 = vld [vmem:[#allocation7 + $0x110] sm:$0xff]  ;;  %v318_v54 = vld [vmem:[#allocation7 + $0x128] sm:$0xff] }
  0x9d   : > { %640 = vmatprep.subr.bf16.mxu0 %v639_v20  ;;  %v320_v55 = vld [vmem:[#allocation7 + $0x138] sm:$0xff]  ;;  %v661_v56 = vpack.c.bf16 %v315_v53, %v313_v52  ;;  %v317_v58 = vld [vmem:[#allocation7 + $0x120] sm:$0xff]  ;;  %v319_v59 = vld [vmem:[#allocation7 + $0x130] sm:$0xff]  ;;  %v349_v36 = vsub.s32 0, %v348_v35 }
  0x9e   : > { %v663_v57 = vpack.c.bf16 %v320_v55, %v318_v54  ;;  %v322_v60 = vld [vmem:[#allocation7 + $0x148] sm:$0xff]  ;;  %v324_v61 = vld [vmem:[#allocation7 + $0x158] sm:$0xff]  ;;  %v665_v62 = vpack.c.bf16 %v319_v59, %v317_v58  ;;  %v321_v0 = vld [vmem:[#allocation7 + $0x140] sm:$0xff]  ;;  %v455_v59 = vsub.s32 1, %v348_v35 }
  0x9f   : > { %v667_v63 = vpack.c.bf16 %v324_v61, %v322_v60  ;;  %v323_v1 = vld [vmem:[#allocation7 + $0x150] sm:$0xff]  ;;  %v326_v2 = vld [vmem:[#allocation7 + $0x168] sm:$0xff]  ;;  %v328_v3 = vld [vmem:[#allocation7 + $0x178] sm:$0xff]  ;;  %v465_v60 = vsub.s32 2, %v348_v35 }
  0xa0   : > { %642 = vmatpush1.bf16.msra.mxu0 %v641_v25  ;;  %v669_v4 = vpack.c.bf16 %v323_v1, %v321_v0  ;;  %v671_v5 = vpack.c.bf16 %v328_v3, %v326_v2  ;;  %v325_v6 = vld [vmem:[#allocation7 + $0x160] sm:$0xff]  ;;  %v327_v7 = vld [vmem:[#allocation7 + $0x170] sm:$0xff]  ;;  %v330_v8 = vld [vmem:[#allocation7 + $0x188] sm:$0xff] }
  0xa1   : > { %644 = vmatprep.subr.bf16.mxu0 %v643_v26  ;;  %v332_v9 = vld [vmem:[#allocation7 + $0x198] sm:$0xff]  ;;  %v673_v10 = vpack.c.bf16 %v327_v7, %v325_v6  ;;  %v329_v12 = vld [vmem:[#allocation7 + $0x180] sm:$0xff]  ;;  %v331_v13 = vld [vmem:[#allocation7 + $0x190] sm:$0xff] }
  0xa2   : > { %v675_v11 = vpack.c.bf16 %v332_v9, %v330_v8  ;;  %v334_v14 = vld [vmem:[#allocation7 + $0x1a8] sm:$0xff]  ;;  %v336_v15 = vld [vmem:[#allocation7 + $0x1b8] sm:$0xff]  ;;  %v677_v16 = vpack.c.bf16 %v331_v13, %v329_v12  ;;  %v333_v18 = vld [vmem:[#allocation7 + $0x1a0] sm:$0xff] }
  0xa3   : > { %v679_v17 = vpack.c.bf16 %v336_v15, %v334_v14  ;;  %v335_v19 = vld [vmem:[#allocation7 + $0x1b0] sm:$0xff]  ;;  %v338_v20 = vld [vmem:[#allocation7 + $0x1c8] sm:$0xff]  ;;  %v340_v21 = vld [vmem:[#allocation7 + $0x1d8] sm:$0xff] }
  0xa4   : > { %646 = vmatpush1.bf16.msra.mxu0 %v645_v31  ;;  %v681_v22 = vpack.c.bf16 %v335_v19, %v333_v18  ;;  %v683_v23 = vpack.c.bf16 %v340_v21, %v338_v20  ;;  %v337_v24 = vld [vmem:[#allocation7 + $0x1c0] sm:$0xff]  ;;  %v339_v25 = vld [vmem:[#allocation7 + $0x1d0] sm:$0xff]  ;;  %v342_v26 = vld [vmem:[#allocation7 + $0x1e8] sm:$0xff] }
  0xa5   : > { %648 = vmatprep.subr.bf16.mxu0 %v647_v32  ;;  %v344_v27 = vld [vmem:[#allocation7 + $0x1f8] sm:$0xff]  ;;  %v685_v28 = vpack.c.bf16 %v339_v25, %v337_v24  ;;  %v341_v30 = vld [vmem:[#allocation7 + $0x1e0] sm:$0xff]  ;;  %v343_v31 = vld [vmem:[#allocation7 + $0x1f0] sm:$0xff] }
  0xa6   : > { %v687_v29 = vpack.c.bf16 %v344_v27, %v342_v26  ;;  %v689_v32 = vpack.c.bf16 %v343_v31, %v341_v30  ;;  %v279_v33 = vld [vmem:[%s232_s6] sm:$0xff] }
  0xa7   : > { %v426_v42 = vld [vmem:[%s241_s7] sm:$0xff] }
  0xa8   : > { %650 = vmatpush1.bf16.msra.mxu0 %v649_v37  ;;  %v345_v37 = vld [vmem:[#allocation8] sm:$0xff] }
  0xa9   : > { %652 = vmatprep.subr.bf16.mxu0 %v651_v38  ;;  %v346_v38 = vld [vmem:[#allocation8 + $0x8] sm:$0xff]  ;;  %v350_v39 = vrot.slane %v345_v37, %v349_v36  ;;  %v456_v61 = vrot.slane %v345_v37, %v455_v59  ;;  %v466_v0 = vrot.slane %v345_v37, %v465_v60 }
  0xaa   : > { %v354_v40 = vrot.slane %v346_v38, %v349_v36  ;;  %v470_v1 = vrot.slane %v346_v38, %v465_v60 }
  0xac   : > { %654 = vmatpush1.bf16.msra.mxu0 %v653_v44 }
  0xad   : > { %656 = vmatprep.subr.bf16.mxu0 %v655_v45  ;;  %v427_v45 = vld [vmem:[%s241_s7 + $0x8] sm:$0xff] }
  0xb0   : > { %658 = vmatpush1.bf16.msra.mxu0 %v657_v50  ;;  %v437_v50 = vand.u32 127, %v347_v34 }
  0xb1   : > { %660 = vmatprep.subr.bf16.mxu0 %v659_v51 }
  0xb2   : > { %vm439_vm0 = vcmp.lt.s32.totalorder %v437_v50, 32 }
  0xb4   : > { %662 = vmatpush1.bf16.msra.mxu0 %v661_v56 }
  0xb5   : > { %664 = vmatprep.subr.bf16.mxu0 %v663_v57 }
  0xb8   : > { %666 = vmatpush1.bf16.msra.mxu0 %v665_v62  ;;  %v460_v62 = vrot.slane %v346_v38, %v455_v59 }
  0xb9   : > { %668 = vmatprep.subr.bf16.mxu0 %v667_v63 }
  0xbc   : > { %670 = vmatpush1.bf16.msra.mxu0 %v669_v4 }
  0xbd   : > { %672 = vmatprep.subr.bf16.mxu0 %v671_v5 }
  0xc0   : > { %674 = vmatpush1.bf16.msra.mxu0 %v673_v10 }
  0xc1   : > { %676 = vmatprep.subr.bf16.mxu0 %v675_v11 }
  0xc4   : > { %678 = vmatpush1.bf16.msra.mxu0 %v677_v16 }
  0xc5   : > { %680 = vmatprep.subr.bf16.mxu0 %v679_v17 }
  0xc8   : > { %682 = vmatpush1.bf16.msra.mxu0 %v681_v22 }
  0xc9   : > { %684 = vmatprep.subr.bf16.mxu0 %v683_v23 }
  0xcc   : > { %686 = vmatpush1.bf16.msra.mxu0 %v685_v28 }
  0xcd   : > { %688 = vmatprep.subr.bf16.mxu0 %v687_v29 }
  0xd0   : > { %690 = vmatpush1.bf16.msra.mxu0 %v689_v32 }
  0xd3   : > { %420 = vmatmul.mubr.f32.vlgmr.msra.gmra.mrb[0].mxu0 %v279_v33 }
 0x1a6   : > { %v421_v41 = vpop.f32.mrb[0].mxu0 }
 0x1a7   : > { %v422_v43 = vadd.f32 %v421_v41, %v350_v39  ;;  %v423_v44 = vpop.f32.mrb[1].mxu0 }
 0x1a8   : > { %v424_v46 = vadd.f32 %v423_v44, %v354_v40 }
 0x1a9   : > { %v428_v47 = vadd.f32 %v426_v42, %v422_v43 }
 0x1aa   : > { %v429_v48 = vadd.f32 %v427_v45, %v424_v46 }
 0x1ac   : > { %v430_v49 = vadd.f32 %v429_v48, %v428_v47 }
 0x1ae   : > { %431 = vadd.xlane.f32.xlu0 %v430_v49 }
 0x23b   : > { %v432_v51 = vpop.xlane.xlu0 %431 }
 0x23c   : > { %v433_v52 = vmul.f32 0.03125, %v432_v51 }
 0x23e   : > { %v434_v53 = vsub.f32 %v428_v47, %v433_v52 }
 0x240   : > { %v441_v54 = vsel %vm439_vm0, %v434_v53, 0.0 }
 0x241   : > { %v443_v55 = vmul.f32 %v441_v54, %v441_v54 }
 0x243   : > { %446 = vadd.xlane.f32.xlu0 %v443_v55 }
 0x2d0   : > { %v447_v56 = vpop.xlane.xlu0 %446 }
 0x2d1   : > { %v448_v57 = vmul.f32 0.03125, %v447_v56 }
 0x2d3   : > { %v449_v58 = vadd.f32 1e-12, %v448_v57 }
 0x2d5   : > { %765 = vrsqrt.f32 %v449_v58 }
 0x2df   : > { %v766_v63 = vpop.eup %765 }
 0x2e0   : > { %v451_v2 = vmul.f32 %v766_v63, %v441_v54  ;;  %v452_v3 = vmul.f32 0.0, %v766_v63 }
 0x2e2   : > { %v461_v4 = vmul.f32 %v456_v61, %v451_v2  ;;  %v462_v5 = vmul.f32 %v460_v62, %v452_v3 }
 0x2e4   : > { %v471_v6 = vadd.f32 %v466_v0, %v461_v4  ;;  %v472_v7 = vadd.f32 %v470_v1, %v462_v5 }
 0x2e6   : > { %473 = vst [vmem:[%s278_s20] sm:$0xff] %v471_v6  ;;  %474 = vst [vmem:[%s278_s20 + $0x8] sm:$0xff] %v472_v7 }
 0x2e7   : > { %896 = shalt.err (!%p893_p7)
}
 0x2e8   : > { %s897_s8 = scalar_lea.hbm %s1233_s25, 256  ;;  %s901_s29 = scalar_lea.hbm %s1281_s4, 512 }
 0x2e9   : > { %p898_p1 = scmp.ne.s32.totalorder %s1233_s25, %s897_s8  ;;  %p902_p0 = scmp.lt.u32.totalorder %s1233_s25, %s1281_s4 }
 0x2ea   : > { %p903_p9 = scmp.lt.u32.totalorder %s901_s29, %s897_s8  ;;  %p905_p2 = scmp.lt.u32.totalorder %s897_s8, %s1233_s25 }
 0x2eb   : > { %p899_p8 = pnand %p898_p1, %p1301_p13 }
 0x2ec   : > { %p904_p12 = por %p903_p9, %p902_p0 }
 0x2ed   : > { %p900_p11 = pneg %p899_p8 }
 0x2ee   : > { %p906_p6 = por %p905_p2, %p904_p12 }
 0x2f0   : > { %p907_p10 = pnand %p906_p6, %p900_p11 }
 0x2f2   : > { %910 = shalt.err (!%p907_p10)
}
 0x2f3   : > { %703 = dma.vmem_to_hbm [thread:$0]  (%p1301_p13), %s1235_s24, 256, %s1233_s25, %s476_s2  }
 0x2f4 PF: > { %s502_s5 = sand.u32 1, %s949_s15   ;;  %p1302_p4 = scmp.ne.s32.totalorder %s1288_s22, 0 }
 0x2f5   : > { %p1303_p5 = scmp.ge.s32.totalorder %s961_s18, 2  ;;  %s503_s7 = scalar_lea.sflag [#allocation4], %s502_s5 }
 0x2f7   : > { %p720_p3 = pnand %p1303_p5, %p1302_p4 }
 0x2f9   : > { %944 = dma.done.wait (!%p720_p3), %s503_s7, 256  }
 0x2fa   : > { %946 = vsyncadd (!%p720_p3), %s503_s7, 4294967040  ;;  %p21_p7 = scmp.ge.s32.totalorder %s1105_s9, 4   ;;  %s1304_s15 = smov %s953_s16 }
 0x2fb   : > { %s1305_s16 = smov %s957_s17  ;;  %s1306_s17 = smov %s1121_s12 }
 0x2fc   : > { %s1307_s18 = smov %s1105_s9  ;;  %23 = sbr.rel (!%p21_p7) target bundleno = 10 (0xa), region = 102 }
 0x303   :  { %508 = vsyncpa [#allocation3], 1 }
 0x304   :  { %510 = vsyncpa [#allocation3 + $0x1], 1 }
 0x305   :  { %511 = vsyncpa [#allocation6], 1 }
 0x306   :  { %513 = vsyncpa [#allocation6 + $0x1], 1 }
 0x307   :  { %514 = vsyncpa [#allocation9], 1 }
 0x308   :  { %515 = vsyncpa [#allocation4], 1 }
 0x309   :  { %517 = vsyncpa [#allocation4 + $0x1], 1 }

</bundles_post_ra>
